<compile_context>
chip_gen: v5e
topology: v5e:2x2
jax: 0.10.0
libtpu: 0.0.40
codegen_flags: <defaults>
</compile_context>

<pallas_src>
import functools

import jax
import jax.numpy as jnp
from jax.experimental import pallas as pl
from jax.experimental.pallas import tpu as pltpu

BN_EPS = 1e-5        # PyTorch BatchNorm1d default eps
_LANE = 128
_SUBLANE = 8
_NEG = -1e30         # bias for padded softmax lanes -> exp() == 0


def _static_discriminator_kernel(x_ref, w1_ref, b1_ref, w2_ref, b2_ref,
                                 w3_ref, b3_ref, o_ref):
    x = x_ref[...]                                   # bf16/f32 operands straight to MXU

    # Block 1: Linear (BN folded in) -> Dropout (identity, eval) -> ReLU
    h = jnp.dot(x, w1_ref[...], preferred_element_type=jnp.float32) + b1_ref[...]
    h = jnp.maximum(h, 0.0)

    # Block 2: Linear (BN folded in) -> Dropout (identity, eval) -> ReLU
    h = jnp.dot(h.astype(w2_ref.dtype), w2_ref[...],
                preferred_element_type=jnp.float32) + b2_ref[...]
    h = jnp.maximum(h, 0.0)

    # Last layer: Linear -> Softmax(dim=-1). Padded lanes carry a -1e30 bias.
    logits = jnp.dot(h.astype(w3_ref.dtype), w3_ref[...],
                     preferred_element_type=jnp.float32) + b3_ref[...]
    z = logits - jnp.max(logits, axis=-1, keepdims=True)
    e = jnp.exp(z)
    inv = pl.reciprocal(jnp.sum(e, axis=-1, keepdims=True), approx=True)
    o_ref[...] = (e * inv).astype(o_ref.dtype)


def init_params(key, input_dim, hidden_dim=None, output_dim=2, dtype=jnp.float32):
    """Deterministic parameter init mirroring the PyTorch module shapes."""
    if hidden_dim is None:
        hidden_dim = input_dim // 2
    keys = jax.random.split(key, 6)

    def linear(kw, kb, fan_in, fan_out):
        bound = 1.0 / jnp.sqrt(jnp.float32(fan_in))
        w = jax.random.uniform(kw, (fan_in, fan_out), dtype, -bound, bound)
        b = jax.random.uniform(kb, (1, fan_out), dtype, -bound, bound)
        return w, b

    w1, b1 = linear(keys[0], keys[1], input_dim, hidden_dim)
    w2, b2 = linear(keys[2], keys[3], hidden_dim, hidden_dim)
    w3, b3 = linear(keys[4], keys[5], hidden_dim, output_dim)

    def bn(dim):  # gamma, beta, running_mean, running_var at nn.BatchNorm1d init
        return (jnp.ones((1, dim), dtype), jnp.zeros((1, dim), dtype),
                jnp.zeros((1, dim), dtype), jnp.ones((1, dim), dtype))

    g1, be1, m1, v1 = bn(hidden_dim)
    g2, be2, m2, v2 = bn(hidden_dim)

    return dict(w1=w1, b1=b1, g1=g1, be1=be1, m1=m1, v1=v1,
                w2=w2, b2=b2, g2=g2, be2=be2, m2=m2, v2=v2,
                w3=w3, b3=b3)


def _round_up(n, m):
    return (n + m - 1) // m * m


def _fold_bn(w, b, gamma, beta, mean, var):
    """Fold eval-mode BatchNorm1d into the preceding Linear. Exact rewrite."""
    scale = gamma * jax.lax.rsqrt(var + BN_EPS)        # [1, F]
    return w * scale, (b - mean) * scale + beta


@functools.partial(jax.jit, static_argnames=("block_b", "matmul_dtype"))
def static_discriminator_forward(x, params, *, block_b=None,
                                 matmul_dtype=jnp.bfloat16):
    B, d_in = x.shape
    hid = params["w1"].shape[1]
    out_dim = params["w3"].shape[1]

    # ---- Fold BN into the Linears (eval-mode, zero numerical change).
    w1, b1 = _fold_bn(params["w1"], params["b1"], params["g1"], params["be1"],
                      params["m1"], params["v1"])
    w2, b2 = _fold_bn(params["w2"], params["b2"], params["g2"], params["be2"],
                      params["m2"], params["v2"])
    w3, b3 = params["w3"], params["b3"]

    # ---- Pad feature dims to lane/MXU-friendly multiples of 128.
    d_in_p = _round_up(d_in, _LANE)
    hid_p = _round_up(hid, _LANE)
    out_p = _round_up(out_dim, _LANE)

    w1 = jnp.pad(w1, ((0, d_in_p - d_in), (0, hid_p - hid)))
    b1 = jnp.pad(b1, ((0, 0), (0, hid_p - hid)))
    w2 = jnp.pad(w2, ((0, hid_p - hid), (0, hid_p - hid)))
    b2 = jnp.pad(b2, ((0, 0), (0, hid_p - hid)))
    w3 = jnp.pad(w3, ((0, hid_p - hid), (0, out_p - out_dim)))
    b3 = jnp.pad(b3, ((0, 0), (0, out_p - out_dim)), constant_values=_NEG)

    # ---- Batch tiling: tb multiple of 8 (f32 sublane), capped at 512 rows so
    # large B gives >=2 parallel grid steps (v7x megacore) and fits scoped VMEM.
    if block_b is None:
        tb = min(_round_up(B, _SUBLANE), 512)
    else:
        tb = _round_up(block_b, _SUBLANE)
    B_p = _round_up(B, tb)
    grid = B_p // tb

    # ---- bf16 operands for the MXU; biases / accumulation stay f32.
    x_p = jnp.pad(x, ((0, B_p - B), (0, d_in_p - d_in))).astype(matmul_dtype)
    w1 = w1.astype(matmul_dtype)
    w2 = w2.astype(matmul_dtype)
    w3 = w3.astype(matmul_dtype)
    b1 = b1.astype(jnp.float32)
    b2 = b2.astype(jnp.float32)
    b3 = b3.astype(jnp.float32)

    param_arrays = [w1, b1, w2, b2, w3, b3]
    in_specs = [pl.BlockSpec((tb, d_in_p), lambda i: (i, 0))]
    for p in param_arrays:  # parameters: same block every step -> DMA'd once
        in_specs.append(pl.BlockSpec(p.shape, lambda i: (0, 0)))

    param_bytes = sum(int(p.size) * p.dtype.itemsize for p in param_arrays)
    flops = 2 * B_p * (d_in_p * hid_p + hid_p * hid_p + hid_p * out_p)
    bytes_accessed = (int(x_p.size) * x_p.dtype.itemsize
                      + param_bytes
                      + B_p * out_p * x.dtype.itemsize)
    # Rough double-buffered footprint: x tile, two h tiles, out tile + params.
    vmem_est = 4 * tb * (d_in_p + 2 * hid_p + out_p) * 4 + 4 * param_bytes
    vmem_limit = int(min(max(vmem_est, 32 << 20), 64 << 20))

    out_padded = pl.pallas_call(
        _static_discriminator_kernel,
        out_shape=jax.ShapeDtypeStruct((B_p, out_p), x.dtype),
        grid=(grid,),
        in_specs=in_specs,
        out_specs=pl.BlockSpec((tb, out_p), lambda i: (i, 0)),
        compiler_params=pltpu.CompilerParams(
            dimension_semantics=("parallel",),
            vmem_limit_bytes=vmem_limit),
        cost_estimate=pl.CostEstimate(
            flops=flops,
            transcendentals=B_p * out_p,
            bytes_accessed=bytes_accessed),
    )(x_p, *param_arrays)

    return out_padded[:B, :out_dim]


def _reference_forward(x, params):
    """Pure-JAX f32 reference of the same eval-mode forward pass."""
    h = x @ params["w1"] + params["b1"]
    h = (h - params["m1"]) / jnp.sqrt(params["v1"] + BN_EPS) * params["g1"] + params["be1"]
    h = jnp.maximum(h, 0.0)
    h = h @ params["w2"] + params["b2"]
    h = (h - params["m2"]) / jnp.sqrt(params["v2"] + BN_EPS) * params["g2"] + params["be2"]
    h = jnp.maximum(h, 0.0)
    logits = h @ params["w3"] + params["b3"]
    return jax.nn.softmax(logits, axis=-1)


if __name__ == "__main__":
    input_dim, output_dim, batch = 32, 2, 8  # hidden_dim defaults to input_dim // 2 = 16

    key = jax.random.PRNGKey(0)
    kx, kp = jax.random.split(key)
    x = jax.random.normal(kx, (batch, input_dim), dtype=jnp.float32)
    params = init_params(kp, input_dim, hidden_dim=None, output_dim=output_dim)

    ref = _reference_forward(x, params)

    # f32 MXU path: near-exact vs the pure-JAX reference.
    out_f32 = jax.block_until_ready(
        static_discriminator_forward(x, params, matmul_dtype=jnp.float32))
    assert out_f32.shape == (batch, output_dim)
    assert jnp.allclose(jnp.sum(out_f32, axis=-1), 1.0, atol=5e-3)
    assert jnp.allclose(out_f32, ref, atol=5e-3, rtol=5e-3)

    # bf16 MXU path (default fast path on v6e/v7x): looser tolerance.
    out_bf16 = jax.block_until_ready(static_discriminator_forward(x, params))
    assert out_bf16.shape == (batch, output_dim)
    assert jnp.allclose(jnp.sum(out_bf16, axis=-1), 1.0, atol=5e-3)
    assert jnp.allclose(out_bf16, ref, atol=2e-2, rtol=2e-2)

    print("KERNEL_OK")
</pallas_src>

<mosaic_0001>
module attributes {stable_mosaic.version = 11 : i64} {
  func.func @_static_discriminator_kernel(%arg0: i32, %arg1: memref<8x128xf32, #tpu.memory_space<vmem>>, %arg2: memref<128x128xf32, #tpu.memory_space<vmem>>, %arg3: memref<1x128xf32, #tpu.memory_space<vmem>>, %arg4: memref<128x128xf32, #tpu.memory_space<vmem>>, %arg5: memref<1x128xf32, #tpu.memory_space<vmem>>, %arg6: memref<128x128xf32, #tpu.memory_space<vmem>>, %arg7: memref<1x128xf32, #tpu.memory_space<vmem>>, %arg8: memref<8x128xf32, #tpu.memory_space<vmem>>) attributes {dimension_semantics = [#tpu.dimension_semantics<parallel>], iteration_bounds = array<i64: 1>, scalar_prefetch = 0 : i64, scratch_operands = 0 : i64, tpu.core_type = #tpu.core_type<tc>, window_params = [{transform_indices = @transform_0, window_bounds = array<i64: 8, 128>}, {pipeline_mode = #tpu.pipeline_mode<synchronous>, transform_indices = @transform_1, window_bounds = array<i64: 128, 128>}, {pipeline_mode = #tpu.pipeline_mode<synchronous>, transform_indices = @transform_2, window_bounds = array<i64: 1, 128>}, {pipeline_mode = #tpu.pipeline_mode<synchronous>, transform_indices = @transform_3, window_bounds = array<i64: 128, 128>}, {pipeline_mode = #tpu.pipeline_mode<synchronous>, transform_indices = @transform_4, window_bounds = array<i64: 1, 128>}, {pipeline_mode = #tpu.pipeline_mode<synchronous>, transform_indices = @transform_5, window_bounds = array<i64: 128, 128>}, {pipeline_mode = #tpu.pipeline_mode<synchronous>, transform_indices = @transform_6, window_bounds = array<i64: 1, 128>}, {transform_indices = @transform_7, window_bounds = array<i64: 8, 128>}]} {
    %c0 = arith.constant 0 : index
    %c0_0 = arith.constant 0 : index
    %0 = vector.load %arg1[%c0, %c0_0] : memref<8x128xf32, #tpu.memory_space<vmem>>, vector<8x128xf32>
    %c0_1 = arith.constant 0 : index
    %c0_2 = arith.constant 0 : index
    %1 = vector.load %arg2[%c0_1, %c0_2] : memref<128x128xf32, #tpu.memory_space<vmem>>, vector<128x128xf32>
    %cst = arith.constant dense<0.000000e+00> : vector<8x128xf32>
    %2 = tpu.matmul %0, %1, %cst {dimension_numbers = #tpu.dot_dimension_numbers<[1], [0], [0], [1], [0, 0, 1, 1], [], []>} : vector<8x128xf32>, vector<128x128xf32>, vector<8x128xf32> -> vector<8x128xf32>
    %c0_3 = arith.constant 0 : index
    %c0_4 = arith.constant 0 : index
    %3 = vector.load %arg3[%c0_3, %c0_4] : memref<1x128xf32, #tpu.memory_space<vmem>>, vector<1x128xf32>
    %4 = vector.broadcast %3 : vector<1x128xf32> to vector<8x128xf32>
    %5 = arith.addf %2, %4 : vector<8x128xf32>
    %cst_5 = arith.constant 0.000000e+00 : f32
    %6 = vector.broadcast %cst_5 : f32 to vector<8x128xf32>
    %7 = arith.maximumf %5, %6 : vector<8x128xf32>
    %c0_6 = arith.constant 0 : index
    %c0_7 = arith.constant 0 : index
    %8 = vector.load %arg4[%c0_6, %c0_7] : memref<128x128xf32, #tpu.memory_space<vmem>>, vector<128x128xf32>
    %cst_8 = arith.constant dense<0.000000e+00> : vector<8x128xf32>
    %9 = tpu.matmul %7, %8, %cst_8 {dimension_numbers = #tpu.dot_dimension_numbers<[1], [0], [0], [1], [0, 0, 1, 1], [], []>} : vector<8x128xf32>, vector<128x128xf32>, vector<8x128xf32> -> vector<8x128xf32>
    %c0_9 = arith.constant 0 : index
    %c0_10 = arith.constant 0 : index
    %10 = vector.load %arg5[%c0_9, %c0_10] : memref<1x128xf32, #tpu.memory_space<vmem>>, vector<1x128xf32>
    %11 = vector.broadcast %10 : vector<1x128xf32> to vector<8x128xf32>
    %12 = arith.addf %9, %11 : vector<8x128xf32>
    %cst_11 = arith.constant 0.000000e+00 : f32
    %13 = vector.broadcast %cst_11 : f32 to vector<8x128xf32>
    %14 = arith.maximumf %12, %13 : vector<8x128xf32>
    %c0_12 = arith.constant 0 : index
    %c0_13 = arith.constant 0 : index
    %15 = vector.load %arg6[%c0_12, %c0_13] : memref<128x128xf32, #tpu.memory_space<vmem>>, vector<128x128xf32>
    %cst_14 = arith.constant dense<0.000000e+00> : vector<8x128xf32>
    %16 = tpu.matmul %14, %15, %cst_14 {dimension_numbers = #tpu.dot_dimension_numbers<[1], [0], [0], [1], [0, 0, 1, 1], [], []>} : vector<8x128xf32>, vector<128x128xf32>, vector<8x128xf32> -> vector<8x128xf32>
    %c0_15 = arith.constant 0 : index
    %c0_16 = arith.constant 0 : index
    %17 = vector.load %arg7[%c0_15, %c0_16] : memref<1x128xf32, #tpu.memory_space<vmem>>, vector<1x128xf32>
    %18 = vector.broadcast %17 : vector<1x128xf32> to vector<8x128xf32>
    %19 = arith.addf %16, %18 : vector<8x128xf32>
    %cst_17 = arith.constant dense<0xFF800000> : vector<8xf32>
    %20 = vector.multi_reduction <maximumf>, %19, %cst_17 [1] : vector<8x128xf32> to vector<8xf32>
    %21 = vector.shape_cast %20 : vector<8xf32> to vector<8x1xf32>
    %22 = vector.broadcast %21 : vector<8x1xf32> to vector<8x128xf32>
    %23 = arith.subf %19, %22 : vector<8x128xf32>
    %24 = math.exp %23 : vector<8x128xf32>
    %cst_18 = arith.constant dense<0.000000e+00> : vector<8xf32>
    %25 = vector.multi_reduction <add>, %24, %cst_18 [1] : vector<8x128xf32> to vector<8xf32>
    %26 = vector.shape_cast %25 : vector<8xf32> to vector<8x1xf32>
    %27 = tpu.reciprocal %26 {approx = true} : vector<8x1xf32> -> vector<8x1xf32>
    %28 = vector.broadcast %27 : vector<8x1xf32> to vector<8x128xf32>
    %29 = arith.mulf %24, %28 : vector<8x128xf32>
    %c0_19 = arith.constant 0 : index
    %c0_20 = arith.constant 0 : index
    %30 = vector.load %arg8[%c0_19, %c0_20] : memref<8x128xf32, #tpu.memory_space<vmem>>, vector<8x128xf32>
    tpu.vector_store %arg8[%c0_19, %c0_20], %29 {strides = array<i32>} : memref<8x128xf32, #tpu.memory_space<vmem>>, vector<8x128xf32>,
    return
  }
  func.func @transform_0(%arg0: i32) -> (i32, i32) {
    %c0_i32 = arith.constant 0 : i32
    %c0_i32_0 = arith.constant 0 : i32
    return %arg0, %c0_i32 : i32, i32
  }
  func.func @transform_1(%arg0: i32) -> (i32, i32) {
    %c0_i32 = arith.constant 0 : i32
    %c0_i32_0 = arith.constant 0 : i32
    %c0_i32_1 = arith.constant 0 : i32
    return %c0_i32, %c0_i32_0 : i32, i32
  }
  func.func @transform_2(%arg0: i32) -> (i32, i32) {
    %c0_i32 = arith.constant 0 : i32
    %c0_i32_0 = arith.constant 0 : i32
    %c0_i32_1 = arith.constant 0 : i32
    return %c0_i32, %c0_i32_0 : i32, i32
  }
  func.func @transform_3(%arg0: i32) -> (i32, i32) {
    %c0_i32 = arith.constant 0 : i32
    %c0_i32_0 = arith.constant 0 : i32
    %c0_i32_1 = arith.constant 0 : i32
    return %c0_i32, %c0_i32_0 : i32, i32
  }
  func.func @transform_4(%arg0: i32) -> (i32, i32) {
    %c0_i32 = arith.constant 0 : i32
    %c0_i32_0 = arith.constant 0 : i32
    %c0_i32_1 = arith.constant 0 : i32
    return %c0_i32, %c0_i32_0 : i32, i32
  }
  func.func @transform_5(%arg0: i32) -> (i32, i32) {
    %c0_i32 = arith.constant 0 : i32
    %c0_i32_0 = arith.constant 0 : i32
    %c0_i32_1 = arith.constant 0 : i32
    return %c0_i32, %c0_i32_0 : i32, i32
  }
  func.func @transform_6(%arg0: i32) -> (i32, i32) {
    %c0_i32 = arith.constant 0 : i32
    %c0_i32_0 = arith.constant 0 : i32
    %c0_i32_1 = arith.constant 0 : i32
    return %c0_i32, %c0_i32_0 : i32, i32
  }
  func.func @transform_7(%arg0: i32) -> (i32, i32) {
    %c0_i32 = arith.constant 0 : i32
    %c0_i32_0 = arith.constant 0 : i32
    return %arg0, %c0_i32 : i32, i32
  }
}

</mosaic_0001>

<bundles_post_ra>
// kernel: static_discriminator_forward.1
= control target key start
LH: loop header
LB: loop body
LE: loop exit
PB: predicated region body
PF: predicated region fallthrough
CT: control target
= control target key end

     0   :  { %s369_s1 = inlined_call_operand.vmem [shape: f32[128,128], index: 1, kind: input, shape index: {}]   ;;  %s370_s3 = inlined_call_operand.vmem [shape: f32[128,128], index: 3, kind: input, shape index: {}]   ;;  %s371_s2 = inlined_call_operand.vmem [shape: f32[1,128], index: 2, kind: input, shape index: {}]   ;;  %s372_s0 = inlined_call_operand.vmem [shape: f32[8,128], index: 0, kind: input, shape index: {}]   ;;  %s373_s4 = inlined_call_operand.vmem [shape: f32[1,128], index: 4, kind: input, shape index: {}]   ;;  %s374_s5 = inlined_call_operand.vmem [shape: f32[128,128], index: 5, kind: input, shape index: {}]   ;;  %s375_s6 = inlined_call_operand.vmem [shape: f32[1,128], index: 6, kind: input, shape index: {}]   ;;  %s376_s7 = inlined_call_operand.vmem [shape: f32[8,128], index: 7, kind: output, shape index: {}]  }
   0x1   :  { %v42_v0 = vld [vmem:[%s369_s1 + $0x78] sm:$0xff]  ;;  %v41_v1 = vld [vmem:[%s369_s1 + $0x70] sm:$0xff]  ;;  %v40_v2 = vld [vmem:[%s369_s1 + $0x68] sm:$0xff] }
   0x2   :  { %47 = vmatpush.msra.mxu0 %v42_v0  ;;  %v39_v3 = vld [vmem:[%s369_s1 + $0x60] sm:$0xff]  ;;  %v83_v4 = vld [vmem:[%s370_s3 + $0x78] sm:$0xff]  ;;  %v82_v6 = vld [vmem:[%s370_s3 + $0x70] sm:$0xff] }
   0x3   :  { %v38_v5 = vld [vmem:[%s369_s1 + $0x58] sm:$0xff]  ;;  %88 = vmatpush.msra.mxu1 %v83_v4  ;;  %v81_v7 = vld [vmem:[%s370_s3 + $0x68] sm:$0xff]  ;;  %v37_v8 = vld [vmem:[%s369_s1 + $0x50] sm:$0xff] }
   0x4   :  { %48 = vmatpush.msra.mxu0 %v41_v1  ;;  %v80_v9 = vld [vmem:[%s370_s3 + $0x60] sm:$0xff]  ;;  %v36_v10 = vld [vmem:[%s369_s1 + $0x48] sm:$0xff]  ;;  %v79_v11 = vld [vmem:[%s370_s3 + $0x58] sm:$0xff] }
   0x5   :  { %89 = vmatpush.msra.mxu1 %v82_v6  ;;  %v35_v12 = vld [vmem:[%s369_s1 + $0x40] sm:$0xff]  ;;  %v78_v13 = vld [vmem:[%s370_s3 + $0x50] sm:$0xff]  ;;  %v34_v14 = vld [vmem:[%s369_s1 + $0x38] sm:$0xff] }
   0x6   :  { %49 = vmatpush.msra.mxu0 %v40_v2  ;;  %v77_v15 = vld [vmem:[%s370_s3 + $0x48] sm:$0xff]  ;;  %v33_v16 = vld [vmem:[%s369_s1 + $0x30] sm:$0xff]  ;;  %v76_v17 = vld [vmem:[%s370_s3 + $0x40] sm:$0xff] }
   0x7   :  { %90 = vmatpush.msra.mxu1 %v81_v7  ;;  %v32_v18 = vld [vmem:[%s369_s1 + $0x28] sm:$0xff]  ;;  %v75_v19 = vld [vmem:[%s370_s3 + $0x38] sm:$0xff]  ;;  %v31_v20 = vld [vmem:[%s369_s1 + $0x20] sm:$0xff] }
   0x8   :  { %50 = vmatpush.msra.mxu0 %v39_v3  ;;  %v74_v21 = vld [vmem:[%s370_s3 + $0x30] sm:$0xff]  ;;  %v30_v22 = vld [vmem:[%s369_s1 + $0x18] sm:$0xff]  ;;  %v73_v23 = vld [vmem:[%s370_s3 + $0x28] sm:$0xff] }
   0x9   :  { %91 = vmatpush.msra.mxu1 %v80_v9  ;;  %v29_v24 = vld [vmem:[%s369_s1 + $0x10] sm:$0xff]  ;;  %v72_v25 = vld [vmem:[%s370_s3 + $0x20] sm:$0xff]  ;;  %v28_v26 = vld [vmem:[%s369_s1 + $0x8] sm:$0xff] }
   0xa   :  { %51 = vmatpush.msra.mxu0 %v38_v5  ;;  %v71_v27 = vld [vmem:[%s370_s3 + $0x18] sm:$0xff]  ;;  %v27_v28 = vld [vmem:[%s369_s1] sm:$0xff]  ;;  %v70_v30 = vld [vmem:[%s370_s3 + $0x10] sm:$0xff] }
   0xb   :  { %92 = vmatpush.msra.mxu1 %v79_v11  ;;  %v26_v29 = vld [vmem:[%s372_s0] sm:$0xff]  ;;  %v69_v31 = vld [vmem:[%s370_s3 + $0x8] sm:$0xff]  ;;  %v124_v33 = vld [vmem:[%s374_s5 + $0x78] sm:$0xff] }
   0xc   :  { %52 = vmatpush.msra.mxu0 %v37_v8  ;;  %v68_v32 = vld [vmem:[%s370_s3] sm:$0xff]  ;;  %v123_v34 = vld [vmem:[%s374_s5 + $0x70] sm:$0xff]  ;;  %129 = vmatpush.msra.mxu2 %v124_v33  ;;  %v122_v35 = vld [vmem:[%s374_s5 + $0x68] sm:$0xff] }
   0xd   :  { %93 = vmatpush.msra.mxu1 %v78_v13  ;;  %v121_v36 = vld [vmem:[%s374_s5 + $0x60] sm:$0xff]  ;;  %v120_v37 = vld [vmem:[%s374_s5 + $0x58] sm:$0xff]  ;;  %v119_v38 = vld [vmem:[%s374_s5 + $0x50] sm:$0xff] }
   0xe   :  { %53 = vmatpush.msra.mxu0 %v36_v10  ;;  %130 = vmatpush.msra.mxu2 %v123_v34  ;;  %v118_v39 = vld [vmem:[%s374_s5 + $0x48] sm:$0xff]  ;;  %v117_v40 = vld [vmem:[%s374_s5 + $0x40] sm:$0xff]  ;;  %v116_v41 = vld [vmem:[%s374_s5 + $0x38] sm:$0xff] }
   0xf   :  { %94 = vmatpush.msra.mxu1 %v77_v15  ;;  %v115_v42 = vld [vmem:[%s374_s5 + $0x30] sm:$0xff]  ;;  %v114_v43 = vld [vmem:[%s374_s5 + $0x28] sm:$0xff]  ;;  %v113_v44 = vld [vmem:[%s374_s5 + $0x20] sm:$0xff] }
  0x10   :  { %54 = vmatpush.msra.mxu0 %v35_v12  ;;  %131 = vmatpush.msra.mxu2 %v122_v35  ;;  %v112_v45 = vld [vmem:[%s374_s5 + $0x18] sm:$0xff]  ;;  %v163_v46 = vld [vmem:[%s371_s2] ss:$0 sm:$0xff]  ;;  %v111_v50 = vld [vmem:[%s374_s5 + $0x10] sm:$0xff] }
  0x11   :  { %95 = vmatpush.msra.mxu1 %v76_v17  ;;  %v110_v51 = vld [vmem:[%s374_s5 + $0x8] sm:$0xff]  ;;  %v109_v52 = vld [vmem:[%s374_s5] sm:$0xff] }
  0x12   :  { %55 = vmatpush.msra.mxu0 %v34_v14  ;;  %132 = vmatpush.msra.mxu2 %v121_v36  ;;  %v164_v53 = vld [vmem:[%s373_s4] ss:$0 sm:$0xff] }
  0x13   :  { %96 = vmatpush.msra.mxu1 %v75_v19  ;;  %v165_v57 = vld [vmem:[%s375_s6] ss:$0 sm:$0xff] }
  0x14   :  { %56 = vmatpush.msra.mxu0 %v33_v16  ;;  %133 = vmatpush.msra.mxu2 %v120_v37 }
  0x15   :  { %97 = vmatpush.msra.mxu1 %v74_v21 }
  0x16   :  { %57 = vmatpush.msra.mxu0 %v32_v18  ;;  %134 = vmatpush.msra.mxu2 %v119_v38 }
  0x17   :  { %98 = vmatpush.msra.mxu1 %v73_v23 }
  0x18   :  { %58 = vmatpush.msra.mxu0 %v31_v20  ;;  %135 = vmatpush.msra.mxu2 %v118_v39 }
  0x19   :  { %99 = vmatpush.msra.mxu1 %v72_v25 }
  0x1a   :  { %59 = vmatpush.msra.mxu0 %v30_v22  ;;  %136 = vmatpush.msra.mxu2 %v117_v40 }
  0x1b   :  { %100 = vmatpush.msra.mxu1 %v71_v27 }
  0x1c   :  { %60 = vmatpush.msra.mxu0 %v29_v24  ;;  %137 = vmatpush.msra.mxu2 %v116_v41 }
  0x1d   :  { %101 = vmatpush.msra.mxu1 %v70_v30 }
  0x1e   :  { %61 = vmatpush.msra.mxu0 %v28_v26  ;;  %138 = vmatpush.msra.mxu2 %v115_v42 }
  0x1f   :  { %102 = vmatpush.msra.mxu1 %v69_v31 }
  0x20   :  { %62 = vmatpush.msra.mxu0 %v27_v28  ;;  %139 = vmatpush.msra.mxu2 %v114_v43 }
  0x21   :  { %63 = vmatmul.f32.vlgmr.msra.gmra.mxu0 %v26_v29  ;;  %103 = vmatpush.msra.mxu1 %v68_v32 }
  0x22   :  { %140 = vmatpush.msra.mxu2 %v113_v44 }
  0x24   :  { %141 = vmatpush.msra.mxu2 %v112_v45 }
  0x26   :  { %142 = vmatpush.msra.mxu2 %v111_v50 }
  0x28   :  { %143 = vmatpush.msra.mxu2 %v110_v51 }
  0x2a   :  { %144 = vmatpush.msra.mxu2 %v109_v52 }
  0x9e   :  { %v64_v47 = vpop.f32.mrf.mxu0 }
  0x9f   :  { %v65_v48 = vadd.f32 %v163_v46, %v64_v47 }
  0xa1   :  { %v67_v49 = vmax.f32 %v65_v48, 0.0 }
  0xa3   :  { %104 = vmatmul.f32.vlgmr.msra.gmra.mxu1 %v67_v49 }
 0x120   :  { %v105_v54 = vpop.f32.mrf.mxu1 }
 0x121   :  { %v106_v55 = vadd.f32 %v164_v53, %v105_v54 }
 0x123   :  { %v108_v56 = vmax.f32 %v106_v55, 0.0 }
 0x125   :  { %145 = vmatmul.f32.vlgmr.msra.gmra.mxu2 %v108_v56 }
 0x1a8   :  { %v146_v58 = vpop.f32.mrf.mxu2 }
 0x1a9   :  { %v147_v59 = vadd.f32 %v165_v57, %v146_v58 }
 0x1ab   :  { %149 = vmax.xlane.f32.xlu0 %v147_v59 }
 0x21e   :  { %v150_v60 = vpop.xlane.xlu0 %149 }
 0x21f   :  { %v151_v61 = vsub.f32 %v147_v59, %v150_v60 }
 0x221   :  { %v152_v62 = vmul.f32 1.442695, %v151_v61 }
 0x223   :  { %166 = vpow2.f32 %v152_v62 }
 0x229   :  { %v167_v63 = vpop.eup %166 }
 0x22a   :  { %154 = vadd.xlane.f32.xlu0 %v167_v63 }
 0x29d   :  { %v155_v0 = vpop.xlane.xlu0 %154 }
 0x29e   :  { %168 = vrcp.f32 %v155_v0 }
 0x2a4   :  { %v169_v1 = vpop.eup %168 }
 0x2a5   :  { %v157_v2 = vmul.f32 %v169_v1, %v167_v63 }
 0x2a7   :  { %158 = vst [vmem:[%s376_s7] sm:$0xff] %v157_v2 }

</bundles_post_ra>
